<compile_context>
chip_gen: v6e
topology: v6e:2x2x1
jax: 0.10.0
libtpu: 0.0.40
codegen_flags: <defaults>
</compile_context>

<pallas_src>
import functools

import jax
import jax.numpy as jnp
from jax import lax
from jax.experimental import pallas as pl
from jax.experimental.pallas import tpu as pltpu

LANE = 128
MAX_BLOCK_B = 1024


# ----------------------------------------------------------------------------
# Single-step fused kernel: pricing lookup + concat + relu(x@W1+b1)@W2+b2
# (lane-padded weights, 2 W1 matmuls, lane-dense (1,128) output store)
# ----------------------------------------------------------------------------
def _dqn_fused_step_kernel(x_ref, tidx_ref, table_ref,
                           w1p_ref, b1p_ref, w2p_ref, b2p_ref, q_ref):
    PL = x_ref.shape[1]          # P + L
    T = tidx_ref.shape[1]
    num_times = table_ref.shape[1]

    # Frozen PricingNet stand-in: prediction[t] = pricing_table[time_idx[t]]
    # expressed as a one-hot matmul (robust lowering, no dynamic gather).
    onehot = (lax.broadcasted_iota(jnp.int32, (num_times, T), 0)
              == tidx_ref[...]).astype(jnp.float32)                 # (num_times, T)
    pred = jnp.dot(table_ref[...], onehot,
                   preferred_element_type=jnp.float32)              # (1, T)

    # concat([pos, lp, pred]) @ W1  ==  x_row@W1[:PL] + pred@W1[PL:PL+T]
    h = (jnp.dot(x_ref[...], w1p_ref[0:PL, :],
                 preferred_element_type=jnp.float32)
         + jnp.dot(pred, w1p_ref[PL:PL + T, :],
                   preferred_element_type=jnp.float32)
         + b1p_ref[...])
    h = jnp.maximum(h, 0.0)                                          # ReLU
    q_ref[...] = jnp.dot(h, w2p_ref[...],
                         preferred_element_type=jnp.float32) + b2p_ref[...]


@functools.partial(jax.jit, static_argnames=("output_size",))
def dqn_forward(position, time_idx, last_price, params, *, output_size):
    """Exact DQN.forward semantics: position (P,1), time_idx (T,), last_price (L,)."""
    pos = position.reshape(-1).astype(jnp.float32)        # squeeze(dim=-1)
    lp = last_price.reshape(-1).astype(jnp.float32)
    x_row = jnp.concatenate([pos, lp])[None, :]           # (1, P+L)
    tidx_row = time_idx.reshape(1, -1).astype(jnp.int32)  # (1, T)

    out_pad = params["w2p"].shape[1]
    vmem = pl.BlockSpec(memory_space=pltpu.MemorySpace.VMEM)
    q_pad = pl.pallas_call(
        _dqn_fused_step_kernel,
        out_shape=jax.ShapeDtypeStruct((1, out_pad), jnp.float32),
        in_specs=[vmem] * 7,
        out_specs=vmem,
    )(x_row, tidx_row, params["pricing_table"],
      params["w1p"], params["b1p"], params["w2p"], params["b2p"])
    return q_pad[:, :output_size]


# ----------------------------------------------------------------------------
# Batched fused kernel: N steps/envs per call.  Pricing lookup + concat + MLP
# + masked greedy-action argmax, weights/table VMEM-resident across the grid.
# ----------------------------------------------------------------------------
def _dqn_fused_batched_kernel(output_size, x_ref, tidx_ref, table_ref,
                              w1p_ref, b1p_ref, w2p_ref, b2p_ref,
                              q_ref, act_ref):
    bn, T = tidx_ref.shape
    PL = x_ref.shape[1]
    num_times = table_ref.shape[1]

    # prediction[n, t] = table[time_idx[n, t]] via one-hot + lane reduction.
    m_iota = lax.broadcasted_iota(jnp.int32, (bn, T, num_times), 2)
    onehot = (tidx_ref[...][:, :, None] == m_iota).astype(jnp.float32)   # (bn,T,M)
    pred = jnp.sum(onehot * table_ref[...].reshape(1, 1, num_times),
                   axis=-1)                                               # (bn,T)

    h = (jnp.dot(x_ref[...], w1p_ref[0:PL, :],
                 preferred_element_type=jnp.float32)
         + jnp.dot(pred, w1p_ref[PL:PL + T, :],
                   preferred_element_type=jnp.float32)
         + b1p_ref[...])
    h = jnp.maximum(h, 0.0)
    q = jnp.dot(h, w2p_ref[...],
                preferred_element_type=jnp.float32) + b2p_ref[...]        # (bn, 128)
    q_ref[...] = q

    # Fused greedy action over the VALID columns only (padded lanes masked).
    col = lax.broadcasted_iota(jnp.int32, q.shape, 1)
    valid = col < output_size
    qm = jnp.where(valid, q, jnp.full_like(q, -jnp.inf))
    mx = jnp.max(qm, axis=1, keepdims=True)
    cand = jnp.where((qm == mx) & valid, col, q.shape[1])
    act_ref[...] = jnp.min(cand, axis=1, keepdims=True)


def _choose_tiling(batch):
    """Return (padded_batch, block_b).

    Larger blocks amortize the ~0.35us per-grid-step cost; an even grid-step
    count lets v7x's two TensorCores split the work (no-op on v5e/v6e).
    """
    b = max(8, -(-batch // 8) * 8)                 # sublane-align
    if b <= MAX_BLOCK_B:
        if b % 2 == 0 and b // 2 >= 256:           # worth splitting for v7x
            return b, b // 2
        return b, b                                # single step (e.g. B=256)
    block = MAX_BLOCK_B
    padded = -(-b // block) * block
    if (padded // block) % 2:                      # keep step count even (v7x)
        block = MAX_BLOCK_B // 2
        padded = -(-b // block) * block
        if (padded // block) % 2:
            padded += block
    return padded, block


@functools.partial(jax.jit, static_argnames=("output_size",))
def dqn_forward_batched(positions, time_idx, last_prices, params, *, output_size):
    """Batched DQN forward (replay buffer / multi-env / multi-step).

    positions (N, P[,1]), time_idx (N, T) int, last_prices (N, L).
    Returns (q_padded (N_pad, 128), greedy_action (N_pad, 1)); index lazily
    with [:N, :output_size] / [:N, 0].
    """
    N = positions.shape[0]
    pos2 = positions.reshape(N, -1).astype(jnp.float32)
    lp2 = last_prices.reshape(N, -1).astype(jnp.float32)
    x = jnp.concatenate([pos2, lp2], axis=1)               # (N, P+L)
    tidx = time_idx.reshape(N, -1).astype(jnp.int32)       # (N, T)

    Bp, block_b = _choose_tiling(N)
    if Bp != N:
        x = jnp.pad(x, ((0, Bp - N), (0, 0)))
        tidx = jnp.pad(tidx, ((0, Bp - N), (0, 0)))

    PL = x.shape[1]
    T = tidx.shape[1]
    table = params["pricing_table"]
    w1p, b1p, w2p, b2p = params["w1p"], params["b1p"], params["w2p"], params["b2p"]
    num_times = table.shape[1]
    hid_pad = w1p.shape[1]
    out_pad = w2p.shape[1]
    in_size = w1p.shape[0]

    q_pad, act = pl.pallas_call(
        functools.partial(_dqn_fused_batched_kernel, output_size),
        out_shape=(jax.ShapeDtypeStruct((Bp, out_pad), jnp.float32),
                   jax.ShapeDtypeStruct((Bp, 1), jnp.int32)),
        grid=(Bp // block_b,),
        in_specs=[
            pl.BlockSpec((block_b, PL), lambda i: (i, 0)),
            pl.BlockSpec((block_b, T), lambda i: (i, 0)),
            pl.BlockSpec((1, num_times), lambda i: (0, 0)),      # resident
            pl.BlockSpec((in_size, hid_pad), lambda i: (0, 0)),  # resident
            pl.BlockSpec((1, hid_pad), lambda i: (0, 0)),        # resident
            pl.BlockSpec((hid_pad, out_pad), lambda i: (0, 0)),  # resident
            pl.BlockSpec((1, out_pad), lambda i: (0, 0)),        # resident
        ],
        out_specs=(pl.BlockSpec((block_b, out_pad), lambda i: (i, 0)),
                   pl.BlockSpec((block_b, 1), lambda i: (i, 0))),
        compiler_params=pltpu.CompilerParams(
            dimension_semantics=("parallel",)),
    )(x, tidx, table, w1p, b1p, w2p, b2p)
    return q_pad, act


# ----------------------------------------------------------------------------
# Deterministic parameter init (frozen pricing table + lane-padded MLP weights)
# ----------------------------------------------------------------------------
def init_params(key, input_size, hidden_dim, output_size, num_times, lane=LANE):
    k1, k2, k3, k4, k5 = jax.random.split(key, 5)
    s1 = 1.0 / jnp.sqrt(input_size)
    s2 = 1.0 / jnp.sqrt(hidden_dim)
    w1 = jax.random.uniform(k1, (input_size, hidden_dim), jnp.float32, -s1, s1)
    b1 = jax.random.uniform(k2, (1, hidden_dim), jnp.float32, -s1, s1)
    w2 = jax.random.uniform(k3, (hidden_dim, output_size), jnp.float32, -s2, s2)
    b2 = jax.random.uniform(k4, (1, output_size), jnp.float32, -s2, s2)

    # Lane-dense (128-padded) weight buffers shared by both kernels.
    hid_pad = -(-hidden_dim // lane) * lane
    out_pad = -(-output_size // lane) * lane
    w1p = jnp.zeros((input_size, hid_pad), jnp.float32).at[:, :hidden_dim].set(w1)
    b1p = jnp.zeros((1, hid_pad), jnp.float32).at[:, :hidden_dim].set(b1)
    w2p = jnp.zeros((hid_pad, out_pad), jnp.float32).at[:hidden_dim, :output_size].set(w2)
    b2p = jnp.zeros((1, out_pad), jnp.float32).at[:, :output_size].set(b2)

    pricing_table = jax.random.normal(k5, (1, num_times), jnp.float32)
    return {"w1": w1, "b1": b1, "w2": w2, "b2": b2,
            "w1p": w1p, "b1p": b1p, "w2p": w2p, "b2p": b2p,
            "pricing_table": pricing_table}


if __name__ == "__main__":
    key = jax.random.PRNGKey(0)

    # Shapes implied by forward(): position (P,1), last_price (L,), time_idx (T,)
    P, L, T = 8, 8, 16
    input_size = P + L + T            # 32
    hidden_dim = 32
    output_size = 4
    num_times = 64

    kp, kl, kt, kw, kb = jax.random.split(key, 5)
    position = jax.random.normal(kp, (P, 1), jnp.float32)
    last_price = jax.random.normal(kl, (L,), jnp.float32)
    time_idx = jax.random.randint(kt, (T,), 0, num_times, jnp.int32)

    params = init_params(kw, input_size, hidden_dim, output_size, num_times)

    # --- single-step DQN.forward (fully fused) ---
    qvals = dqn_forward(position, time_idx, last_price, params,
                        output_size=output_size)
    qvals = jax.block_until_ready(qvals)

    prediction = params["pricing_table"][0, time_idx]
    x_row = jnp.concatenate([position.squeeze(-1), last_price, prediction])[None, :]
    ref = (jnp.maximum(x_row @ params["w1"] + params["b1"], 0.0)
           @ params["w2"] + params["b2"])
    assert qvals.shape == (1, output_size)
    assert jnp.allclose(qvals, ref, atol=1e-4, rtol=1e-4)

    # --- batched fused path (replay buffer / multi-env, weights resident) ---
    N = 256
    kb1, kb2, kb3 = jax.random.split(kb, 3)
    positions_b = jax.random.normal(kb1, (N, P, 1), jnp.float32)
    last_prices_b = jax.random.normal(kb2, (N, L), jnp.float32)
    time_idx_b = jax.random.randint(kb3, (N, T), 0, num_times, jnp.int32)

    q_pad, act = dqn_forward_batched(positions_b, time_idx_b, last_prices_b,
                                     params, output_size=output_size)
    q_pad = jax.block_until_ready(q_pad)
    act = jax.block_until_ready(act)

    qb = q_pad[:N, :output_size]            # lazy slice at the consumer
    pred_b = params["pricing_table"][0][time_idx_b]                  # (N, T)
    x_b = jnp.concatenate([positions_b[..., 0], last_prices_b, pred_b], axis=1)
    ref_b = (jnp.maximum(x_b @ params["w1"] + params["b1"], 0.0)
             @ params["w2"] + params["b2"])
    assert qb.shape == (N, output_size)
    assert jnp.allclose(qb, ref_b, atol=1e-4, rtol=1e-4)
    # Fused greedy action must match argmax over the kernel's own q-values.
    assert bool(jnp.all(act[:N, 0] == jnp.argmax(qb, axis=1)))

    print("KERNEL_OK")
</pallas_src>

<mosaic_0001>
module attributes {stable_mosaic.version = 11 : i64} {
  func.func @_dqn_fused_step_kernel(%arg0: memref<1x16xf32, #tpu.memory_space<vmem>>, %arg1: memref<1x16xi32, #tpu.memory_space<vmem>>, %arg2: memref<1x64xf32, #tpu.memory_space<vmem>>, %arg3: memref<32x128xf32, #tpu.memory_space<vmem>>, %arg4: memref<1x128xf32, #tpu.memory_space<vmem>>, %arg5: memref<128x128xf32, #tpu.memory_space<vmem>>, %arg6: memref<1x128xf32, #tpu.memory_space<vmem>>, %arg7: memref<1x128xf32, #tpu.memory_space<vmem>>) attributes {dimension_semantics = [], scalar_prefetch = 0 : i64, scratch_operands = 0 : i64, tpu.core_type = #tpu.core_type<tc>} {
    %0 = tpu.iota {dimensions = array<i32: 0>} : vector<64x16xi32>
    %c0 = arith.constant 0 : index
    %c0_0 = arith.constant 0 : index
    %1 = vector.load %arg1[%c0, %c0_0] : memref<1x16xi32, #tpu.memory_space<vmem>>, vector<1x16xi32>
    %2 = vector.broadcast %1 : vector<1x16xi32> to vector<64x16xi32>
    %3 = arith.cmpi eq, %0, %2 : vector<64x16xi32>
    %4 = arith.extui %3 : vector<64x16xi1> to vector<64x16xi32>
    %5 = arith.sitofp %4 : vector<64x16xi32> to vector<64x16xf32>
    %c0_1 = arith.constant 0 : index
    %c0_2 = arith.constant 0 : index
    %6 = vector.load %arg2[%c0_1, %c0_2] : memref<1x64xf32, #tpu.memory_space<vmem>>, vector<1x64xf32>
    %cst = arith.constant dense<0.000000e+00> : vector<1x16xf32>
    %7 = tpu.matmul %6, %5, %cst {dimension_numbers = #tpu.dot_dimension_numbers<[1], [0], [0], [1], [0, 0, 1, 1], [], []>} : vector<1x64xf32>, vector<64x16xf32>, vector<1x16xf32> -> vector<1x16xf32>
    %c0_3 = arith.constant 0 : index
    %c0_4 = arith.constant 0 : index
    %8 = vector.load %arg0[%c0_3, %c0_4] : memref<1x16xf32, #tpu.memory_space<vmem>>, vector<1x16xf32>
    %c0_5 = arith.constant 0 : index
    %c0_6 = arith.constant 0 : index
    %9 = vector.load %arg3[%c0_5, %c0_6] : memref<32x128xf32, #tpu.memory_space<vmem>>, vector<16x128xf32>
    %cst_7 = arith.constant dense<0.000000e+00> : vector<1x128xf32>
    %10 = tpu.matmul %8, %9, %cst_7 {dimension_numbers = #tpu.dot_dimension_numbers<[1], [0], [0], [1], [0, 0, 1, 1], [], []>} : vector<1x16xf32>, vector<16x128xf32>, vector<1x128xf32> -> vector<1x128xf32>
    %c16 = arith.constant 16 : index
    %c0_8 = arith.constant 0 : index
    %11 = vector.load %arg3[%c16, %c0_8] : memref<32x128xf32, #tpu.memory_space<vmem>>, vector<16x128xf32>
    %cst_9 = arith.constant dense<0.000000e+00> : vector<1x128xf32>
    %12 = tpu.matmul %7, %11, %cst_9 {dimension_numbers = #tpu.dot_dimension_numbers<[1], [0], [0], [1], [0, 0, 1, 1], [], []>} : vector<1x16xf32>, vector<16x128xf32>, vector<1x128xf32> -> vector<1x128xf32>
    %13 = arith.addf %10, %12 : vector<1x128xf32>
    %c0_10 = arith.constant 0 : index
    %c0_11 = arith.constant 0 : index
    %14 = vector.load %arg4[%c0_10, %c0_11] : memref<1x128xf32, #tpu.memory_space<vmem>>, vector<1x128xf32>
    %15 = arith.addf %13, %14 : vector<1x128xf32>
    %cst_12 = arith.constant 0.000000e+00 : f32
    %16 = vector.broadcast %cst_12 : f32 to vector<1x128xf32>
    %17 = arith.maximumf %15, %16 : vector<1x128xf32>
    %c0_13 = arith.constant 0 : index
    %c0_14 = arith.constant 0 : index
    %18 = vector.load %arg5[%c0_13, %c0_14] : memref<128x128xf32, #tpu.memory_space<vmem>>, vector<128x128xf32>
    %cst_15 = arith.constant dense<0.000000e+00> : vector<1x128xf32>
    %19 = tpu.matmul %17, %18, %cst_15 {dimension_numbers = #tpu.dot_dimension_numbers<[1], [0], [0], [1], [0, 0, 1, 1], [], []>} : vector<1x128xf32>, vector<128x128xf32>, vector<1x128xf32> -> vector<1x128xf32>
    %c0_16 = arith.constant 0 : index
    %c0_17 = arith.constant 0 : index
    %20 = vector.load %arg6[%c0_16, %c0_17] : memref<1x128xf32, #tpu.memory_space<vmem>>, vector<1x128xf32>
    %21 = arith.addf %19, %20 : vector<1x128xf32>
    %c0_18 = arith.constant 0 : index
    %c0_19 = arith.constant 0 : index
    %22 = vector.load %arg7[%c0_18, %c0_19] : memref<1x128xf32, #tpu.memory_space<vmem>>, vector<1x128xf32>
    tpu.vector_store %arg7[%c0_18, %c0_19], %21 {strides = array<i32>} : memref<1x128xf32, #tpu.memory_space<vmem>>, vector<1x128xf32>,
    return
  }
}

</mosaic_0001>

<bundles_post_ra>
// kernel: dqn_forward.1
= control target key start
LH: loop header
LB: loop body
LE: loop exit
PB: predicated region body
PF: predicated region fallthrough
CT: control target
= control target key end

     0   :  { %12 = vsyncpa [#allocation3], 0  ;;  %s729_s0 = inlined_call_operand.vmem [shape: f32[1,16], index: 0, kind: input, shape index: {}]   ;;  %s730_s1 = inlined_call_operand.vmem [shape: s32[1,16], index: 1, kind: input, shape index: {}]   ;;  %s731_s2 = inlined_call_operand.vmem [shape: f32[1,64], index: 2, kind: input, shape index: {}]   ;;  %s732_s3 = inlined_call_operand.hbm [shape: f32[32,128], index: 3, kind: input, shape index: {}]   ;;  %s733_s4 = inlined_call_operand.vmem [shape: f32[1,128], index: 4, kind: input, shape index: {}]   ;;  %s734_s5 = inlined_call_operand.hbm [shape: f32[128,128], index: 5, kind: input, shape index: {}]   ;;  %s735_s6 = inlined_call_operand.vmem [shape: f32[1,128], index: 6, kind: input, shape index: {}]   ;;  %s736_s7 = inlined_call_operand.hbm [shape: f32[1,128], index: 7, kind: output, shape index: {}]  }
   0x1   :  { %13 = vsyncpa [#allocation6], 0 }
   0x2   :  { %14 = vsyncpa [#allocation4], 0  ;;  %s621_s24 = smov [#allocation2]  }
   0x3   :  { %s26_s25 = sshll.u32 %s621_s24, 4  ;;  %s27_s25 = int_to_ptr.vmem [resolvable:$true] %s26_s25 }
   0x4   :  { %s563_s26 = scalar_lea.vmem %s27_s25, 512  ;;  %p568_p1 = scmp.lt.s32.totalorder %s27_s25, %s27_s25 }
   0x5   :  { %p564_p0 = scmp.ne.s32.totalorder %s27_s25, %s563_s26  ;;  %p569_p2 = scmp.lt.s32.totalorder %s563_s26, %s563_s26 }
   0x7   :  { %p570_p3 = por %p569_p2, %p568_p1 }
   0x9   :  { %p571_p4 = pnand %p570_p3, %p564_p0 }
   0xb   :  { %574 = shalt.err (!%p571_p4)
}
   0xc   :  { %s622_s27 = smov 128   ;;  %s623_s28 = smov 8  }
   0xd   :  { %32 = dma.hbm_to_vmem [thread:$0]  %s732_s3, 512, %s27_s25, [#allocation3], %s622_s27, %s622_s27, %s623_s28  }
   0xe   :  { %s624_s8 = smov [#allocation5]  }
   0xf   :  { %s40_s9 = sshll.u32 %s624_s8, 4  ;;  %s41_s9 = int_to_ptr.vmem [resolvable:$true] %s40_s9 }
  0x10   :  { %s583_s10 = scalar_lea.vmem %s41_s9, 2048  ;;  %p588_p6 = scmp.lt.s32.totalorder %s41_s9, %s41_s9 }
  0x11   :  { %p584_p5 = scmp.ne.s32.totalorder %s41_s9, %s583_s10  ;;  %p589_p7 = scmp.lt.s32.totalorder %s583_s10, %s583_s10 }
  0x13   :  { %p590_p8 = por %p589_p7, %p588_p6 }
  0x15   :  { %p591_p9 = pnand %p590_p8, %p584_p5 }
  0x17   :  { %594 = shalt.err (!%p591_p9)
}
  0x18   :  { %46 = dma.hbm_to_vmem [thread:$0]  %s734_s5, 2048, %s41_s9, [#allocation6], %s622_s27, %s622_s27, %s623_s28  }
  0x19   :  { %615 = dma.done.wait [#allocation3], 512  }
  0x1a   :  { %616 = vsyncadd [#allocation3], 4294966784 }
  0x1b   :  { %617 = dma.done.wait [#allocation6], 2048  }
  0x1c   :  { %618 = vsyncadd [#allocation6], 4294965248  ;;  %v55_v0 = vlaneseq  ;;  %v625_v1 = vmov 0.0   ;;  %vm626_vm0 = vmmov 0   ;;  %v427_v6 = vld [vmem:[%s730_s1] ss:$0 sm:$0xff] }
  0x1d   :  { %479 = vmatprep.subr.mxu0 %v625_v1  ;;  %495 = vmatprep.mubr.msk.f32.mxu0 %vm626_vm0, %v625_v1  ;;  %v627_v8 = vmov 1.0   ;;  %v93_v12 = vld [vmem:[%s731_s2] sm:$0x1]  ;;  %vm94_vm9 = vcmask 523264   ;;  %v172_v13 = vld [vmem:[#allocation2 + $0x18] sm:$0xff]  ;;  %v171_v14 = vld [vmem:[#allocation2 + $0x10] sm:$0xff] }
  0x1e   :  { %v56_v2 = vshrl.u32 %v55_v0, 7  ;;  %512 = vmatprep.subr.mxu1 %v625_v1  ;;  %544 = vmatprep.mubr.msk.f32.mxu1 %vm626_vm0, %v625_v1  ;;  %v338_v15 = vld [vmem:[#allocation5 + $0x78] sm:$0xff]  ;;  %v337_v16 = vld [vmem:[#allocation5 + $0x70] sm:$0xff]  ;;  %v336_v17 = vld [vmem:[#allocation5 + $0x68] sm:$0xff]  ;;  %vm173_vm10 = vcmask 130048   ;;  %s628_s18 = smov [#allocation7]  }
  0x1f   :  { %513 = vmatpush3.msra.mxu1 %v338_v15  ;;  %v335_v18 = vld [vmem:[#allocation5 + $0x60] sm:$0xff]  ;;  %v334_v19 = vld [vmem:[#allocation5 + $0x58] sm:$0xff]  ;;  %v333_v20 = vld [vmem:[#allocation5 + $0x50] sm:$0xff]  ;;  %s417_s19 = sshll.u32 %s628_s18, 4  ;;  %s418_s19 = int_to_ptr.vmem [resolvable:$true] %s417_s19 }
  0x20   :  { %v63_v3 = vadd.s32 56, %v56_v2  ;;  %v62_v4 = vadd.s32 48, %v56_v2  ;;  %v61_v5 = vadd.s32 40, %v56_v2  ;;  %v60_v7 = vadd.s32 32, %v56_v2  ;;  %514 = vmatprep.subr.mxu1 %v625_v1  ;;  %v332_v21 = vld [vmem:[#allocation5 + $0x48] sm:$0xff]  ;;  %v331_v22 = vld [vmem:[#allocation5 + $0x40] sm:$0xff]  ;;  %p600_p11 = scmp.lt.s32.totalorder %s418_s19, %s418_s19 }
  0x21   :  { %v59_v9 = vadd.s32 24, %v56_v2  ;;  %v58_v10 = vadd.s32 16, %v56_v2  ;;  %v57_v11 = vadd.s32 8, %v56_v2  ;;  %vm69_vm8 = vcmp.eq.s32.totalorder %v56_v2, %v427_v6  ;;  %515 = vmatpush3.msra.mxu1 %v337_v16  ;;  %v330_v23 = vld [vmem:[#allocation5 + $0x38] sm:$0xff]  ;;  %v329_v24 = vld [vmem:[#allocation5 + $0x30] sm:$0xff]  ;;  %v170_v25 = vld [vmem:[#allocation2 + $0x8] sm:$0xff] }
  0x22   :  { %vm76_vm1 = vcmp.eq.s32.totalorder %v63_v3, %v427_v6  ;;  %vm75_vm2 = vcmp.eq.s32.totalorder %v62_v4, %v427_v6  ;;  %vm74_vm3 = vcmp.eq.s32.totalorder %v61_v5, %v427_v6  ;;  %vm73_vm4 = vcmp.eq.s32.totalorder %v60_v7, %v427_v6  ;;  %516 = vmatprep.subr.mxu1 %v625_v1  ;;  %v169_v27 = vld [vmem:[#allocation2] sm:$0xff]  ;;  %v328_v30 = vld [vmem:[#allocation5 + $0x28] sm:$0xff]  ;;  %v326_v32 = vld [vmem:[#allocation5 + $0x18] sm:$0xff]  ;;  %s595_s20 = scalar_lea.vmem %s418_s19, 16  ;;  %s599_s21 = scalar_lea.vmem %s418_s19, 32 }
  0x23   :  { %480 = vmatpush3.msk.msra.mxu0 %vm76_vm1, %v627_v8  ;;  %vm72_vm5 = vcmp.eq.s32.totalorder %v59_v9, %v427_v6  ;;  %vm71_vm6 = vcmp.eq.s32.totalorder %v58_v10, %v427_v6  ;;  %vm70_vm7 = vcmp.eq.s32.totalorder %v57_v11, %v427_v6  ;;  %517 = vmatpush3.msra.mxu1 %v336_v17  ;;  %v168_v29 = vld [vmem:[%s729_s0] sm:$0x1]  ;;  %v325_v33 = vld [vmem:[#allocation5 + $0x10] sm:$0xff]  ;;  %v324_v34 = vld [vmem:[#allocation5 + $0x8] sm:$0xff]  ;;  %p596_p10 = scmp.ne.s32.totalorder %s418_s19, %s595_s20  ;;  %p601_p12 = scmp.lt.s32.totalorder %s599_s21, %s595_s20 }
  0x24   :  { %481 = vmatprep.subr.mxu0 %v625_v1  ;;  %518 = vmatprep.subr.mxu1 %v625_v1  ;;  %v327_v31 = vld [vmem:[#allocation5 + $0x20] sm:$0xff] }
  0x25   :  { %482 = vmatpush3.msk.msra.mxu0 %vm75_vm2, %v627_v8  ;;  %519 = vmatpush3.msra.mxu1 %v335_v18  ;;  %v323_v35 = vld [vmem:[#allocation5] sm:$0xff]  ;;  %p602_p13 = por %p601_p12, %p600_p11 }
  0x26   :  { %483 = vmatprep.subr.mxu0 %v625_v1  ;;  %520 = vmatprep.subr.mxu1 %v625_v1  ;;  %v320_v39 = vld [vmem:[%s733_s4] sm:$0x1] }
  0x27   :  { %484 = vmatpush3.msk.msra.mxu0 %vm74_vm3, %v627_v8  ;;  %521 = vmatpush3.msra.mxu1 %v334_v19  ;;  %v339_v44 = vld [vmem:[%s735_s6] sm:$0x1]  ;;  %p603_p0 = pnand %p602_p13, %p596_p10 }
  0x28   :  { %485 = vmatprep.subr.mxu0 %v625_v1  ;;  %522 = vmatprep.subr.mxu1 %v625_v1 }
  0x29   :  { %486 = vmatpush3.msk.msra.mxu0 %vm73_vm4, %v627_v8  ;;  %523 = vmatpush3.msra.mxu1 %v333_v20 }
  0x2a   :  { %487 = vmatprep.subr.mxu0 %v625_v1  ;;  %524 = vmatprep.subr.mxu1 %v625_v1 }
  0x2b   :  { %488 = vmatpush3.msk.msra.mxu0 %vm72_vm5, %v627_v8  ;;  %525 = vmatpush3.msra.mxu1 %v332_v21 }
  0x2c   :  { %489 = vmatprep.subr.mxu0 %v625_v1  ;;  %526 = vmatprep.subr.mxu1 %v625_v1 }
  0x2d   :  { %490 = vmatpush3.msk.msra.mxu0 %vm71_vm6, %v627_v8  ;;  %527 = vmatpush3.msra.mxu1 %v331_v22 }
  0x2e   :  { %491 = vmatprep.subr.mxu0 %v625_v1  ;;  %528 = vmatprep.subr.mxu1 %v625_v1 }
  0x2f   :  { %492 = vmatpush3.msk.msra.mxu0 %vm70_vm7, %v627_v8  ;;  %529 = vmatpush3.msra.mxu1 %v330_v23 }
  0x30   :  { %493 = vmatprep.subr.mxu0 %v625_v1  ;;  %530 = vmatprep.subr.mxu1 %v625_v1 }
  0x31   :  { %494 = vmatpush3.msk.msra.mxu0 %vm69_vm8, %v627_v8  ;;  %531 = vmatpush3.msra.mxu1 %v329_v24 }
  0x32   :  { %496 = vmatmul.mubr.msk.f32.vlgmr.msra.gmra.mxu0 %vm94_vm9, %v93_v12  ;;  %498 = vmatprep.subr.mxu0 %v625_v1 }
  0x33   :  { %499 = vmatpush3.msra.mxu0 %v172_v13  ;;  %502 = vmatprep.mubr.msk.f32.mxu0 %vm626_vm0, %v625_v1 }
  0x34   :  { %500 = vmatprep.subr.mxu0 %v625_v1  ;;  %532 = vmatprep.subr.mxu1 %v625_v1 }
  0x35   :  { %501 = vmatpush3.msra.mxu0 %v171_v14  ;;  %533 = vmatpush3.msra.mxu1 %v328_v30 }
  0x36   :  { %505 = vmatprep.subr.mxu0 %v625_v1  ;;  %534 = vmatprep.subr.mxu1 %v625_v1 }
  0x37   :  { %535 = vmatpush3.msra.mxu1 %v327_v31 }
  0x38   :  { %536 = vmatprep.subr.mxu1 %v625_v1 }
  0x39   :  { %537 = vmatpush3.msra.mxu1 %v326_v32 }
  0x3a   :  { %538 = vmatprep.subr.mxu1 %v625_v1 }
  0x3b   :  { %539 = vmatpush3.msra.mxu1 %v325_v33 }
  0x3c   :  { %540 = vmatprep.subr.mxu1 %v625_v1 }
  0x3d   :  { %541 = vmatpush3.msra.mxu1 %v324_v34 }
  0x3e   :  { %542 = vmatprep.subr.mxu1 %v625_v1 }
  0x3f   :  { %543 = vmatpush3.msra.mxu1 %v323_v35 }
  0xf2   :  { %v164_v26 = vpop.f32.mrf.mxu0 }
  0xf3   :  { %503 = vmatmul.mubr.msk.f32.vlgmr.msra.gmra.mxu0 %vm173_vm10, %v164_v26 }
  0xf4   :  { %506 = vmatpush3.msra.mxu0 %v170_v25  ;;  %v497_v28 = vpop.f32.mrf.mxu0  ;;  %509 = vmatprep.mubr.msk.f32.mxu0 %vm626_vm0, %v625_v1 }
  0xf5   :  { %507 = vmatprep.subr.mxu0 %v625_v1 }
  0xf6   :  { %508 = vmatpush3.msra.mxu0 %v169_v27 }
  0xf7   :  { %510 = vmatmul.mubr.msk.f32.vlgmr.msra.gmra.mxu0 %vm173_vm10, %v168_v29 }
 0x1b3   :  { %v243_v36 = vpop.f32.mrf.mxu0 }
 0x1b5   :  { %v504_v37 = vpop.f32.mrf.mxu0 }
 0x1b7   :  { %v316_v38 = vpop.f32.mrf.mxu0 }
 0x1b8   :  { %v317_v40 = vadd.f32 %v316_v38, %v243_v36 }
 0x1b9   :  { %v511_v41 = vpop.f32.mrf.mxu0 }
 0x1ba   :  { %v321_v42 = vadd.f32 %v320_v39, %v317_v40 }
 0x1bc   :  { %v322_v43 = vmax.f32 %v321_v42, 0.0 }
 0x1be   :  { %545 = vmatmul.mubr.f32.vlgmr.msra.gmra.mxu1 %v322_v43 }
 0x27e   :  { %v406_v45 = vpop.f32.mrf.mxu1 }
 0x27f   :  { %v407_v46 = vadd.f32 %v406_v45, %v339_v44 }
 0x280   :  { %v546_v47 = vpop.f32.mrf.mxu1 }
 0x281   :  { %410 = vst [vmem:[#allocation7] sm:$0x1] %v407_v46 }
 0x282   :  { %606 = shalt.err (!%p603_p0)
}
 0x283   :  { %420 = dma.vmem_to_hbm [thread:$0]  %s418_s19, 16, %s736_s7, [#allocation4]  }
 0x284   :  { %619 = dma.done.wait [#allocation4], 16  }
 0x285   :  { %620 = vsyncadd [#allocation4], 4294967280 }
 0x286   :  { %424 = vsyncpa [#allocation3], 1 }
 0x287   :  { %425 = vsyncpa [#allocation6], 1 }
 0x288   :  { %426 = vsyncpa [#allocation4], 1 }

</bundles_post_ra>
